<compile_context>
chip_gen: v6e
topology: v6e:2x2x1
jax: 0.10.0
libtpu: 0.0.40
codegen_flags: <defaults>
</compile_context>

<pallas_src>
import math

import jax
import jax.numpy as jnp
from jax import lax
from jax.experimental import pallas as pl
from jax.experimental.pallas import tpu as pltpu


def _mix32(x):
    """lowbias32 integer finalizer: strong avalanche, pure VPU int ops."""
    x = x ^ (x >> jnp.uint32(16))
    x = x * jnp.uint32(0x7FEB352D)
    x = x ^ (x >> jnp.uint32(15))
    x = x * jnp.uint32(0x846CA68B)
    x = x ^ (x >> jnp.uint32(16))
    return x


def _bits_to_unit_float(bits):
    """uint32 bits -> float32 in [0, 1) via the exponent bit-trick."""
    one_bits = jnp.uint32(0x3F800000)
    return lax.bitcast_convert_type((bits >> jnp.uint32(9)) | one_bits,
                                    jnp.float32) - jnp.float32(1.0)


def _randn_kernel(seed_ref, o_ref):
    """Fill one [tile_rows, D] block with i.i.d. N(0, 1) samples."""
    tile_rows, d = o_ref.shape
    dual = (d % 2 == 0) and ((d // 2) % 128 == 0)
    pair_cols = d // 2 if dual else d   # one (u1,u2) pair per pair-plane element

    # Hash the seed once into a scalar key (full avalanche), so distinct seeds
    # give decorrelated streams after the XOR-fold below.
    seed_u = seed_ref[0].astype(jnp.uint32)
    key = _mix32(seed_u * jnp.uint32(0x9E3779B9) + jnp.uint32(0x85EBCA6B))

    # Global pair index, built in uint32 from the start (no int32 overflow).
    base_row = (pl.program_id(0) * tile_rows).astype(jnp.uint32)
    row = lax.broadcasted_iota(jnp.int32, (tile_rows, pair_cols), 0).astype(jnp.uint32)
    col = lax.broadcasted_iota(jnp.int32, (tile_rows, pair_cols), 1).astype(jnp.uint32)
    pair_idx = (base_row + row) * jnp.uint32(pair_cols) + col

    # One full mix per pair; second stream is a cheap odd-multiply + xorshift.
    bits1 = _mix32(pair_idx ^ key)
    bits2 = bits1 * jnp.uint32(0x9E3779B9)
    bits2 = bits2 ^ (bits2 >> jnp.uint32(16))

    u_a = _bits_to_unit_float(bits1)            # [0, 1)
    u_b = _bits_to_unit_float(bits2)            # [0, 1)
    u1 = jnp.float32(1.0) - u_a                 # (0, 1] so log(u1) is finite

    # Box-Muller.  Compute cos once; derive sin from sqrt(1 - cos^2) (EUP slot)
    # with its sign taken from the half-period of theta (u_b >= 0.5 -> sin < 0).
    r = jnp.sqrt(jnp.float32(-2.0) * jnp.log(u1))
    theta = jnp.float32(2.0 * math.pi) * u_b
    c = jnp.cos(theta)

    if dual:
        s_abs = jnp.sqrt(jnp.maximum(jnp.float32(1.0) - c * c, jnp.float32(0.0)))
        s = jnp.where(u_b < jnp.float32(0.5), s_abs, -s_abs)
        o_ref[:, :pair_cols] = r * c            # lane-aligned half
        o_ref[:, pair_cols:] = r * s            # lane-aligned half
    else:
        # Fallback for repr_dim/2 not lane-aligned: cos-only, full-width store.
        o_ref[...] = r * c


def _round_up(x, m):
    return ((x + m - 1) // m) * m


def _choose_tiling(rows, max_tile_rows=2048, min_rows_for_split=1024):
    """Pick (num_tiles, tile_rows, rows_pad).

    Prefers (a) tiles big enough to amortize per-step overhead, (b) >= 2
    balanced tiles on large outputs so v7x's two TensorCores both get work,
    and (c) an exact tiling (rows_pad == rows) whenever rows is sublane
    aligned, so the wrapper needs no post-kernel slice copy.
    """
    rows8 = _round_up(rows, 8)
    min_tiles = max(1, -(-rows8 // max_tile_rows))
    if rows8 >= min_rows_for_split:
        min_tiles = max(min_tiles, 2)

    if rows == rows8:
        blocks = rows8 // 8
        # Smallest tile count >= min_tiles that divides rows exactly (bounded
        # so a pathological divisor structure can't explode the grid).
        for nt in range(min_tiles, min(blocks, 4 * min_tiles) + 1):
            if blocks % nt == 0:
                return nt, rows8 // nt, rows8          # exact: no slice needed

    nt = min_tiles
    tile_rows = _round_up(-(-rows8 // nt), 8)
    return nt, tile_rows, tile_rows * nt


def mock_model_forward(states, actions, *, bs, n_steps, repr_dim=256, seed=0):
    """Pallas equivalent of MockModel.forward.

    states / actions are ignored (as in the PyTorch reference); returns a fresh
    standard-normal tensor of shape [bs, n_steps, repr_dim], float32.
    """
    del states, actions  # never read by the reference forward pass

    rows = bs * n_steps
    d = repr_dim
    num_tiles, tile_rows, rows_pad = _choose_tiling(rows)

    seed_arr = jnp.array([seed], dtype=jnp.int32)

    out2d = pl.pallas_call(
        _randn_kernel,
        out_shape=jax.ShapeDtypeStruct((rows_pad, d), jnp.float32),
        grid_spec=pltpu.PrefetchScalarGridSpec(
            num_scalar_prefetch=1,          # seed lands in SMEM
            grid=(num_tiles,),              # one step per row tile
            in_specs=[],
            out_specs=pl.BlockSpec(
                (tile_rows, d),             # lane- and sublane-dense block
                lambda i, seed_ref: (i, 0),
            ),
        ),
        compiler_params=pltpu.CompilerParams(
            # Blocks are independent (stateless counter-based RNG), so the
            # grid axis can be sharded across v7x's two TensorCores.
            dimension_semantics=("parallel",),
            # Explicit scoped-VMEM budget: safe on v5e's 16 MiB default and
            # inside v7x's 64 MiB physical VMEM even with 2048-row tiles.
            vmem_limit_bytes=32 * 1024 * 1024,
        ),
    )(seed_arr)

    if rows_pad == rows:
        return out2d.reshape(bs, n_steps, d)        # pure reshape, no copy
    return out2d[:rows].reshape(bs, n_steps, d)     # ragged path: one slice


def _check_stats(x, shape):
    assert x.shape == shape, x.shape
    assert x.dtype == jnp.float32, x.dtype
    m = float(jnp.mean(x))
    s = float(jnp.std(x))
    assert abs(m) < 0.1 and 0.8 < s < 1.2, (m, s)
    assert bool(jnp.all(jnp.isfinite(x)))


if __name__ == "__main__":
    # Small, deterministic example shapes consistent with the module docstring.
    B = 2          # bs
    T = 17         # n_steps
    D = 256        # repr_dim
    Ch, H, W = 4, 16, 16

    key = jax.random.PRNGKey(0)
    k1, k2 = jax.random.split(key)
    states = jax.random.normal(k1, (B, T, Ch, H, W), dtype=jnp.float32)
    actions = jax.random.normal(k2, (B, T - 1, 2), dtype=jnp.float32)

    # Small / ragged path (34 rows -> single padded tile + slice).
    preds = mock_model_forward(states, actions, bs=B, n_steps=T, repr_dim=D, seed=0)
    preds = jax.block_until_ready(preds)
    _check_stats(preds, (B, T, D))

    # Module-default path (bs=64 -> 1088 rows, exact 2-tile split, no slice),
    # exercising the aligned multi-tile / core-parallel configuration.
    preds_big = mock_model_forward(states, actions, bs=64, n_steps=T, repr_dim=D, seed=1)
    preds_big = jax.block_until_ready(preds_big)
    _check_stats(preds_big, (64, T, D))

    print("KERNEL_OK")
</pallas_src>

<mosaic_0001>
module attributes {stable_mosaic.version = 11 : i64} {
  func.func @_randn_kernel(%arg0: i32, %arg1: memref<1xi32, #tpu.memory_space<smem>>, %arg2: memref<40x256xf32, #tpu.memory_space<vmem>>) attributes {dimension_semantics = [#tpu.dimension_semantics<parallel>], iteration_bounds = array<i64: 1>, scalar_prefetch = 1 : i64, scratch_operands = 0 : i64, tpu.core_type = #tpu.core_type<tc>, window_params = [{transform_indices = @transform_0, window_bounds = array<i64: 40, 256>}]} {
    %c0 = arith.constant 0 : index
    %0 = memref.load %arg1[%c0] : memref<1xi32, #tpu.memory_space<smem>>
    %c-1640531527_i32 = arith.constant -1640531527 : i32
    %1 = arith.muli %0, %c-1640531527_i32 : i32
    %c-2048144789_i32 = arith.constant -2048144789 : i32
    %2 = arith.addi %1, %c-2048144789_i32 : i32
    %c16_i32 = arith.constant 16 : i32
    %3 = arith.shrui %2, %c16_i32 : i32
    %4 = arith.xori %2, %3 : i32
    %c2146121005_i32 = arith.constant 2146121005 : i32
    %5 = arith.muli %4, %c2146121005_i32 : i32
    %c15_i32 = arith.constant 15 : i32
    %6 = arith.shrui %5, %c15_i32 : i32
    %7 = arith.xori %5, %6 : i32
    %c-2073254261_i32 = arith.constant -2073254261 : i32
    %8 = arith.muli %7, %c-2073254261_i32 : i32
    %c16_i32_0 = arith.constant 16 : i32
    %9 = arith.shrui %8, %c16_i32_0 : i32
    %10 = arith.xori %8, %9 : i32
    %c40_i32 = arith.constant 40 : i32
    %11 = arith.muli %arg0, %c40_i32 : i32
    %12 = tpu.iota {dimensions = array<i32: 0>} : vector<40x128xi32>
    %13 = tpu.iota {dimensions = array<i32: 1>} : vector<40x128xi32>
    %14 = vector.broadcast %11 : i32 to vector<40x128xi32>
    %15 = arith.addi %14, %12 : vector<40x128xi32>
    %c128_i32 = arith.constant 128 : i32
    %16 = vector.broadcast %c128_i32 : i32 to vector<40x128xi32>
    %17 = arith.muli %15, %16 : vector<40x128xi32>
    %18 = arith.addi %17, %13 : vector<40x128xi32>
    %19 = vector.broadcast %10 : i32 to vector<40x128xi32>
    %20 = arith.xori %18, %19 : vector<40x128xi32>
    %c16_i32_1 = arith.constant 16 : i32
    %21 = vector.broadcast %c16_i32_1 : i32 to vector<40x128xi32>
    %22 = arith.shrui %20, %21 : vector<40x128xi32>
    %23 = arith.xori %20, %22 : vector<40x128xi32>
    %c2146121005_i32_2 = arith.constant 2146121005 : i32
    %24 = vector.broadcast %c2146121005_i32_2 : i32 to vector<40x128xi32>
    %25 = arith.muli %23, %24 : vector<40x128xi32>
    %c15_i32_3 = arith.constant 15 : i32
    %26 = vector.broadcast %c15_i32_3 : i32 to vector<40x128xi32>
    %27 = arith.shrui %25, %26 : vector<40x128xi32>
    %28 = arith.xori %25, %27 : vector<40x128xi32>
    %c-2073254261_i32_4 = arith.constant -2073254261 : i32
    %29 = vector.broadcast %c-2073254261_i32_4 : i32 to vector<40x128xi32>
    %30 = arith.muli %28, %29 : vector<40x128xi32>
    %c16_i32_5 = arith.constant 16 : i32
    %31 = vector.broadcast %c16_i32_5 : i32 to vector<40x128xi32>
    %32 = arith.shrui %30, %31 : vector<40x128xi32>
    %33 = arith.xori %30, %32 : vector<40x128xi32>
    %c-1640531527_i32_6 = arith.constant -1640531527 : i32
    %34 = vector.broadcast %c-1640531527_i32_6 : i32 to vector<40x128xi32>
    %35 = arith.muli %33, %34 : vector<40x128xi32>
    %c16_i32_7 = arith.constant 16 : i32
    %36 = vector.broadcast %c16_i32_7 : i32 to vector<40x128xi32>
    %37 = arith.shrui %35, %36 : vector<40x128xi32>
    %38 = arith.xori %35, %37 : vector<40x128xi32>
    %c9_i32 = arith.constant 9 : i32
    %39 = vector.broadcast %c9_i32 : i32 to vector<40x128xi32>
    %40 = arith.shrui %33, %39 : vector<40x128xi32>
    %c1065353216_i32 = arith.constant 1065353216 : i32
    %41 = vector.broadcast %c1065353216_i32 : i32 to vector<40x128xi32>
    %42 = arith.ori %40, %41 : vector<40x128xi32>
    %43 = tpu.bitcast %42 : vector<40x128xi32> -> vector<40x128xf32>
    %cst = arith.constant 1.000000e+00 : f32
    %44 = vector.broadcast %cst : f32 to vector<40x128xf32>
    %45 = arith.subf %43, %44 : vector<40x128xf32>
    %c9_i32_8 = arith.constant 9 : i32
    %46 = vector.broadcast %c9_i32_8 : i32 to vector<40x128xi32>
    %47 = arith.shrui %38, %46 : vector<40x128xi32>
    %c1065353216_i32_9 = arith.constant 1065353216 : i32
    %48 = vector.broadcast %c1065353216_i32_9 : i32 to vector<40x128xi32>
    %49 = arith.ori %47, %48 : vector<40x128xi32>
    %50 = tpu.bitcast %49 : vector<40x128xi32> -> vector<40x128xf32>
    %cst_10 = arith.constant 1.000000e+00 : f32
    %51 = vector.broadcast %cst_10 : f32 to vector<40x128xf32>
    %52 = arith.subf %50, %51 : vector<40x128xf32>
    %cst_11 = arith.constant 1.000000e+00 : f32
    %53 = vector.broadcast %cst_11 : f32 to vector<40x128xf32>
    %54 = arith.subf %53, %45 : vector<40x128xf32>
    %55 = math.log %54 : vector<40x128xf32>
    %cst_12 = arith.constant -2.000000e+00 : f32
    %56 = vector.broadcast %cst_12 : f32 to vector<40x128xf32>
    %57 = arith.mulf %56, %55 : vector<40x128xf32>
    %58 = math.sqrt %57 : vector<40x128xf32>
    %cst_13 = arith.constant 6.28318548 : f32
    %59 = vector.broadcast %cst_13 : f32 to vector<40x128xf32>
    %60 = arith.mulf %59, %52 : vector<40x128xf32>
    %61 = math.cos %60 : vector<40x128xf32>
    %62 = arith.mulf %61, %61 : vector<40x128xf32>
    %cst_14 = arith.constant 1.000000e+00 : f32
    %63 = vector.broadcast %cst_14 : f32 to vector<40x128xf32>
    %64 = arith.subf %63, %62 : vector<40x128xf32>
    %cst_15 = arith.constant 0.000000e+00 : f32
    %65 = vector.broadcast %cst_15 : f32 to vector<40x128xf32>
    %66 = arith.maximumf %64, %65 : vector<40x128xf32>
    %67 = math.sqrt %66 : vector<40x128xf32>
    %cst_16 = arith.constant 5.000000e-01 : f32
    %68 = vector.broadcast %cst_16 : f32 to vector<40x128xf32>
    %69 = arith.cmpf olt, %52, %68 : vector<40x128xf32>
    %cst_17 = arith.constant 0.000000e+00 : f32
    %70 = vector.broadcast %cst_17 : f32 to vector<40x128xf32>
    %71 = arith.subf %70, %67 : vector<40x128xf32>
    %72 = arith.select %69, %67, %71 : vector<40x128xi1>, vector<40x128xf32>
    %73 = arith.mulf %58, %61 : vector<40x128xf32>
    %c0_18 = arith.constant 0 : index
    %c0_19 = arith.constant 0 : index
    %74 = vector.load %arg2[%c0_18, %c0_19] : memref<40x256xf32, #tpu.memory_space<vmem>>, vector<40x128xf32>
    tpu.vector_store %arg2[%c0_18, %c0_19], %73 {strides = array<i32>} : memref<40x256xf32, #tpu.memory_space<vmem>>, vector<40x128xf32>,
    %75 = arith.mulf %58, %72 : vector<40x128xf32>
    %c0_20 = arith.constant 0 : index
    %c128 = arith.constant 128 : index
    %76 = vector.load %arg2[%c0_20, %c128] : memref<40x256xf32, #tpu.memory_space<vmem>>, vector<40x128xf32>
    tpu.vector_store %arg2[%c0_20, %c128], %75 {strides = array<i32>} : memref<40x256xf32, #tpu.memory_space<vmem>>, vector<40x128xf32>,
    return
  }
  func.func @transform_0(%arg0: i32, %arg1: memref<1xi32, #tpu.memory_space<smem>>) -> (i32, i32) {
    %c0_i32 = arith.constant 0 : i32
    %c0_i32_0 = arith.constant 0 : i32
    return %arg0, %c0_i32 : i32, i32
  }
}

</mosaic_0001>

<bundles_post_ra>
// kernel: tpu_custom_call.1
= control target key start
LH: loop header
LB: loop body
LE: loop exit
PB: predicated region body
PF: predicated region fallthrough
CT: control target
= control target key end

     0   :  { %7 = vsyncpa [#allocation5], 0  ;;  %v20_v0 = vlaneseq  ;;  %s958_s17 = smov [#allocation4]   ;;  %s1518_s0 = inlined_call_operand.<no memory space> [shape: s32[1], index: 0, kind: input, shape index: {}]   ;;  %s1519_s1 = inlined_call_operand.hbm [shape: f32[40,256], index: 1, kind: output, shape index: {}]  }
   0x1   :  { %s9_s8 = smul.u32 2654435769, %s1518_s0  ;;  %s810_s18 = sshll.u32 %s958_s17, 4  ;;  %s811_s18 = int_to_ptr.vmem [resolvable:$true] %s810_s18 }
   0x2   :  { %v21_v1 = vshrl.u32 %v20_v0, 7  ;;  %v27_v6 = vand.u32 127, %v20_v0  ;;  %s930_s19 = scalar_lea.vmem %s811_s18, 1280  ;;  %p935_p1 = scmp.lt.s32.totalorder %s811_s18, %s811_s18 }
   0x3   :  { %s10_s9 = sadd.s32 2246822507, %s9_s8  ;;  %p931_p0 = scmp.ne.s32.totalorder %s811_s18, %s930_s19 }
   0x4   :  { %s11_s10 = sshrl.u32 %s10_s9, 16  ;;  %v22_v2 = vadd.s32 8, %v21_v1  ;;  %v23_v3 = vadd.s32 16, %v21_v1  ;;  %v24_v4 = vadd.s32 24, %v21_v1  ;;  %v25_v5 = vadd.s32 32, %v21_v1  ;;  %p936_p2 = scmp.lt.s32.totalorder %s930_s19, %s930_s19 }
   0x5   :  { %s12_s11 = sxor.u32 %s11_s10, %s10_s9  ;;  %v34_v7 = vmul.u32 128, %v21_v1 }
   0x6   :  { %s13_s12 = smul.u32 2146121005, %s12_s11  ;;  %v35_v8 = vmul.u32 128, %v22_v2  ;;  %v36_v9 = vmul.u32 128, %v23_v3  ;;  %p937_p3 = por %p936_p2, %p935_p1 }
   0x7   :  { %v37_v10 = vmul.u32 128, %v24_v4  ;;  %v38_v11 = vmul.u32 128, %v25_v5  ;;  %v39_v13 = vadd.s32 %v34_v7, %v27_v6 }
   0x8   :  { %s14_s13 = sshrl.u32 %s13_s12, 15  ;;  %v40_v14 = vadd.s32 %v35_v8, %v27_v6  ;;  %v41_v15 = vadd.s32 %v36_v9, %v27_v6  ;;  %p938_p4 = pnand %p937_p3, %p931_p0 }
   0x9   :  { %s15_s14 = sxor.u32 %s14_s13, %s13_s12  ;;  %v43_v12 = vadd.s32 %v38_v11, %v27_v6  ;;  %v42_v16 = vadd.s32 %v37_v10, %v27_v6 }
   0xa   :  { %s16_s15 = smul.u32 2221713035, %s15_s14 }
   0xc   :  { %s17_s0 = sshrl.u32 %s16_s15, 16 }
   0xd   :  { %s18_s16 = sxor.u32 %s17_s0, %s16_s15 }
   0xe   :  { %v44_v17 = vstv %s18_s16 }
   0xf   :  { %v45_v18 = vxor.u32 %v44_v17, %v39_v13  ;;  %v46_v19 = vxor.u32 %v44_v17, %v40_v14  ;;  %v47_v20 = vxor.u32 %v44_v17, %v41_v15  ;;  %v48_v21 = vxor.u32 %v44_v17, %v42_v16 }
  0x10   :  { %v49_v22 = vxor.u32 %v44_v17, %v43_v12 }
  0x11   :  { %v50_v23 = vshrl.u32 %v45_v18, 16  ;;  %v51_v24 = vshrl.u32 %v46_v19, 16  ;;  %v52_v25 = vshrl.u32 %v47_v20, 16  ;;  %v53_v26 = vshrl.u32 %v48_v21, 16 }
  0x12   :  { %v54_v27 = vshrl.u32 %v49_v22, 16 }
  0x13   :  { %v55_v28 = vxor.u32 %v50_v23, %v45_v18  ;;  %v56_v29 = vxor.u32 %v51_v24, %v46_v19  ;;  %v57_v30 = vxor.u32 %v52_v25, %v47_v20  ;;  %v58_v31 = vxor.u32 %v53_v26, %v48_v21 }
  0x14   :  { %v59_v32 = vxor.u32 %v54_v27, %v49_v22 }
  0x15   :  { %v60_v33 = vmul.u32 2146121005, %v55_v28  ;;  %v61_v34 = vmul.u32 2146121005, %v56_v29 }
  0x16   :  { %v62_v35 = vmul.u32 2146121005, %v57_v30  ;;  %v63_v36 = vmul.u32 2146121005, %v58_v31 }
  0x17   :  { %v65_v37 = vshrl.u32 %v60_v33, 15  ;;  %v66_v38 = vshrl.u32 %v61_v34, 15  ;;  %v64_v40 = vmul.u32 2146121005, %v59_v32 }
  0x18   :  { %v67_v39 = vshrl.u32 %v62_v35, 15  ;;  %v68_v44 = vshrl.u32 %v63_v36, 15 }
  0x19   :  { %v70_v41 = vxor.u32 %v65_v37, %v60_v33  ;;  %v71_v42 = vxor.u32 %v66_v38, %v61_v34  ;;  %v69_v48 = vshrl.u32 %v64_v40, 15 }
  0x1a   :  { %v72_v43 = vxor.u32 %v67_v39, %v62_v35  ;;  %v73_v51 = vxor.u32 %v68_v44, %v63_v36 }
  0x1b   :  { %v75_v45 = vmul.u32 2221713035, %v70_v41  ;;  %v76_v46 = vmul.u32 2221713035, %v71_v42  ;;  %v74_v55 = vxor.u32 %v69_v48, %v64_v40 }
  0x1c   :  { %v77_v47 = vmul.u32 2221713035, %v72_v43  ;;  %v78_v58 = vmul.u32 2221713035, %v73_v51 }
  0x1d   :  { %v80_v49 = vshrl.u32 %v75_v45, 16  ;;  %v81_v50 = vshrl.u32 %v76_v46, 16  ;;  %v79_v62 = vmul.u32 2221713035, %v74_v55 }
  0x1e   :  { %v82_v54 = vshrl.u32 %v77_v47, 16  ;;  %v83_v1 = vshrl.u32 %v78_v58, 16 }
  0x1f   :  { %v85_v52 = vxor.u32 %v80_v49, %v75_v45  ;;  %v86_v53 = vxor.u32 %v81_v50, %v76_v46  ;;  %v84_v5 = vshrl.u32 %v79_v62, 16 }
  0x20   :  { %v87_v61 = vxor.u32 %v82_v54, %v77_v47  ;;  %v88_v8 = vxor.u32 %v83_v1, %v78_v58  ;;  %v953_v1 = vmov 2475754826  }
  0x21   :  { %v90_v56 = vmul.u32 2654435769, %v85_v52  ;;  %v91_v57 = vmul.u32 2654435769, %v86_v53  ;;  %v89_v12 = vxor.u32 %v84_v5, %v79_v62  ;;  %v105_v17 = vshrl.u32 %v85_v52, 9 }
  0x22   :  { %v92_v2 = vmul.u32 2654435769, %v87_v61  ;;  %v93_v14 = vmul.u32 2654435769, %v88_v8  ;;  %v106_v20 = vshrl.u32 %v86_v53, 9  ;;  %v107_v21 = vshrl.u32 %v87_v61, 9 }
  0x23   :  { %v95_v59 = vshrl.u32 %v90_v56, 16  ;;  %v96_v60 = vshrl.u32 %v91_v57, 16  ;;  %v94_v19 = vmul.u32 2654435769, %v89_v12  ;;  %v110_v25 = vor.u32 1065353216, %v105_v17 }
  0x24   :  { %v97_v9 = vshrl.u32 %v92_v2, 16  ;;  %v98_v23 = vshrl.u32 %v93_v14, 16  ;;  %v111_v29 = vor.u32 1065353216, %v106_v20  ;;  %v108_v30 = vshrl.u32 %v88_v8, 9 }
  0x25   :  { %v100_v63 = vxor.u32 %v95_v59, %v90_v56  ;;  %v101_v0 = vxor.u32 %v96_v60, %v91_v57  ;;  %v99_v28 = vshrl.u32 %v94_v19, 16  ;;  %v112_v31 = vor.u32 1065353216, %v107_v21 }
  0x26   :  { %v102_v16 = vxor.u32 %v97_v9, %v92_v2  ;;  %v103_v33 = vxor.u32 %v98_v23, %v93_v14  ;;  %v109_v34 = vshrl.u32 %v89_v12, 9  ;;  %v821_v36 = vadd.f32 -1.0, %v110_v25 }
  0x27   :  { %v125_v3 = vshrl.u32 %v100_v63, 9  ;;  %v126_v4 = vshrl.u32 %v101_v0, 9  ;;  %v104_v39 = vxor.u32 %v99_v28, %v94_v19  ;;  %v822_v40 = vadd.f32 -1.0, %v111_v29 }
  0x28   :  { %v127_v26 = vshrl.u32 %v102_v16, 9  ;;  %v113_v42 = vor.u32 1065353216, %v108_v30  ;;  %v823_v43 = vadd.f32 -1.0, %v112_v31  ;;  %v114_v45 = vor.u32 1065353216, %v109_v34 }
  0x29   :  { %v130_v6 = vor.u32 1065353216, %v125_v3  ;;  %v131_v7 = vor.u32 1065353216, %v126_v4  ;;  %v128_v47 = vshrl.u32 %v103_v33, 9  ;;  %v145_v49 = vsub.f32 1.0, %v821_v36 }
  0x2a   :  { %v132_v37 = vor.u32 1065353216, %v127_v26  ;;  %v129_v51 = vshrl.u32 %v104_v39, 9  ;;  %v146_v52 = vsub.f32 1.0, %v822_v40  ;;  %v991_v54 = vadd.f32 -1.0, %v113_v42 }
  0x2b   :  { %v974_v10 = vadd.f32 -1.0, %v130_v6  ;;  %v976_v11 = vadd.f32 -1.0, %v131_v7  ;;  %v147_v55 = vsub.f32 1.0, %v823_v43  ;;  %v994_v57 = vadd.f32 -1.0, %v114_v45 }
  0x2c   :  { %v987_v48 = vadd.f32 -1.0, %v132_v37  ;;  %v133_v59 = vor.u32 1065353216, %v128_v47  ;;  %880 = vlog2.f32 %v145_v49  ;;  %v134_v62 = vor.u32 1065353216, %v129_v51 }
  0x2d   :  { %v979_v13 = vmul.f32 6.2831855, %v974_v10  ;;  %v982_v15 = vmul.f32 6.2831855, %v976_v11  ;;  %882 = vlog2.f32 %v146_v52  ;;  %v952_v63 = vmov 683565275  }
  0x2e   :  { %v997_v60 = vmul.f32 6.2831855, %v987_v48  ;;  %v148_v3 = vsub.f32 1.0, %v991_v54  ;;  %884 = vlog2.f32 %v147_v55  ;;  %v954_v7 = vmov 2131351028  }
  0x2f   :  { %v208_v18 = vand.u32 2139095040, %v979_v13  ;;  %v311_v24 = vand.u32 2139095040, %v982_v15  ;;  %v205_v38 = vand.u32 2147483647, %v979_v13  ;;  %v308_v56 = vand.u32 2147483647, %v982_v15 }
  0x30   :  { %v955_v9 = vmov 2102212464   ;;  %v411_v17 = vand.u32 2147483647, %v997_v60  ;;  %v957_v25 = vmov 1326507024   ;;  %886 = vlog2.f32 %v148_v3 }
  0x31   :  { %v209_v22 = vshrl.u32 %v208_v18, 23  ;;  %v312_v35 = vshrl.u32 %v311_v24, 23  ;;  %v212_v50 = vand.u32 8388607, %v205_v38  ;;  %v1004_v5 = vand.u32 8388607, %v308_v56 }
  0x32   :  { %v414_v18 = vand.u32 2139095040, %v997_v60  ;;  %v1019_v42 = vadd.f32 -1.0, %v133_v59  ;;  %v1036_v55 = vand.u32 8388607, %v411_v17  ;;  %v149_v59 = vsub.f32 1.0, %v994_v57 }
  0x33   :  { %v831_v27 = vadd.s32 4294967169, %v209_v22  ;;  %v835_v46 = vadd.s32 4294967169, %v312_v35  ;;  %v213_v61 = vor.u32 8388608, %v212_v50  ;;  %v956_v22 = vmov 920167782  }
  0x34   :  { %v316_v45 = vor.u32 8388608, %v1004_v5  ;;  %888 = vlog2.f32 %v149_v59  ;;  %vm207_vm14 = vcmp.lt.s32.totalorder %v979_v13, 0 }
  0x35   :  { %v215_v32 = vadd.s32 1, %v831_v27  ;;  %v318_v58 = vadd.s32 1, %v835_v46  ;;  %v1010_v16 = vshll.u32 %v213_v61, 8  ;;  %v415_v61 = vshrl.u32 %v414_v18, 23 }
  0x36   :  { %v1052_v3 = vshll.u32 %v316_v45, 8  ;;  %v419_v18 = vor.u32 8388608, %v1036_v55 }
  0x37   :  { %vm216_vm0 = vcmp.gt.s32.totalorder %v215_v32, 0  ;;  %vm319_vm1 = vcmp.gt.s32.totalorder %v318_v58, 0 }
  0x38   :  { %v217_v41 = vsel %vm216_vm0, %v215_v32, 0  ;;  %v320_v27 = vsel %vm319_vm1, %v318_v58, 0  ;;  %vm1141_vm1 = vcmp.le.f32.partialorder %v205_v38, 0.7853982 }
  0x39   :  { %v219_v44 = vand.u32 31, %v217_v41  ;;  %v218_v4 = vshrl.u32 %v217_v41, 5  ;;  %v322_v41 = vand.u32 31, %v320_v27  ;;  %v881_v51 = vpop.eup %880 }
  0x3a   :  { %v883_v58 = vpop.eup %882 }
  0x3b   :  { %v220_v53 = vsub.s32 32, %v219_v44  ;;  %v222_v0 = vshll.u32 %v952_v63, %v219_v44  ;;  %v225_v6 = vshll.u32 %v953_v1, %v219_v44  ;;  %v228_v8 = vshll.u32 %v954_v7, %v219_v44 }
  0x3c   :  { %v231_v12 = vshll.u32 %v955_v9, %v219_v44  ;;  %v234_v24 = vshll.u32 %v956_v22, %v219_v44  ;;  %vm237_vm2 = vcmp.lt.s32.totalorder %v218_v4, 1  ;;  %vm239_vm3 = vcmp.lt.s32.totalorder %v218_v4, 3 }
  0x3d   :  { %v223_v2 = vshrl.u32 %v953_v1, %v220_v53  ;;  %v221_v14 = vshrl.u32 %v952_v63, %v220_v53  ;;  %v226_v20 = vshrl.u32 %v954_v7, %v220_v53  ;;  %v229_v21 = vshrl.u32 %v955_v9, %v220_v53 }
  0x3e   :  { %v232_v23 = vshrl.u32 %v956_v22, %v220_v53  ;;  %v235_v26 = vshrl.u32 %v957_v25, %v220_v53  ;;  %vm238_vm4 = vcmp.lt.s32.totalorder %v218_v4, 2  ;;  %vm240_vm5 = vcmp.lt.s32.totalorder %v218_v4, 4 }
  0x3f   :  { %v224_v19 = vor.u32 %v223_v2, %v222_v0  ;;  %v227_v28 = vor.u32 %v226_v20, %v225_v6  ;;  %v230_v29 = vor.u32 %v229_v21, %v228_v8  ;;  %v323_v54 = vsub.s32 32, %v322_v41  ;;  %v885_v0 = vpop.eup %884 }
  0x40   :  { %v233_v30 = vor.u32 %v232_v23, %v231_v12  ;;  %v236_v31 = vor.u32 %v235_v26, %v234_v24  ;;  %v1039_v2 = vadd.f32 -1.0, %v134_v62  ;;  %v1042_v4 = vmul.f32 6.2831855, %v1019_v42 }
  0x41   :  { %v241_v32 = vsel %vm237_vm2, %v221_v14, %v224_v19  ;;  %v242_v33 = vsel %vm240_vm5, %v230_v29, 2102212464  ;;  %v245_v34 = vsel %vm237_vm2, %v224_v19, %v227_v28  ;;  %v249_v36 = vsel %vm237_vm2, %v227_v28, %v230_v29 }
  0x42   :  { %v246_v35 = vsel %vm240_vm5, %v233_v30, 920167782  ;;  %v243_v37 = vsel %vm239_vm3, %v227_v28, %v242_v33  ;;  %v250_v40 = vsel %vm240_vm5, %v236_v31, 1326507024  ;;  %v325_v6 = vshll.u32 %v952_v63, %v322_v41 }
  0x43   :  { %v247_v39 = vsel %vm239_vm3, %v230_v29, %v246_v35  ;;  %v251_v44 = vsel %vm239_vm3, %v233_v30, %v250_v40  ;;  %v244_v46 = vsel %vm238_vm4, %v241_v32, %v243_v37  ;;  %v326_v12 = vshrl.u32 %v953_v1, %v323_v54 }
  0x44   :  { %v248_v43 = vsel %vm238_vm4, %v245_v34, %v247_v39  ;;  %v252_v47 = vsel %vm238_vm4, %v249_v36, %v251_v44  ;;  %v260_v5 = vmul.u32 %v1010_v16, %v244_v46  ;;  %v328_v14 = vshll.u32 %v953_v1, %v322_v41 }
  0x45   :  { %v1026_v49 = vmul.u32.u64.low %v1010_v16, %v248_v43  ;;  %v1027_v50 = vmul.u32.u64.high %v1010_v16, %v248_v43, %v1026_v49  ;;  %v1031_v52 = vmul.u32.u64.low %v1010_v16, %v252_v47  ;;  %v1032_v53 = vmul.u32.u64.high %v1010_v16, %v252_v47, %v1031_v52 }
  0x46   :  { %v329_v19 = vshrl.u32 %v954_v7, %v323_v54  ;;  %v321_v62 = vshrl.u32 %v320_v27, 5  ;;  %v331_v20 = vshll.u32 %v954_v7, %v322_v41  ;;  %v839_v21 = vadd.s32 4294967169, %v415_v61 }
  0x47   :  { %v263_v8 = vadd.s32 1, %v1027_v50  ;;  %vm262_vm6 = vc.u32 %v1032_v53, %v1026_v49  ;;  %v514_v23 = vand.u32 2147483647, %v1042_v4  ;;  %v151_v24 = vmul.f32 0.6931472, %v881_v51 }
  0x48   :  { %v324_v28 = vshrl.u32 %v952_v63, %v323_v54  ;;  %v517_v29 = vand.u32 2139095040, %v1042_v4  ;;  %v327_v30 = vor.u32 %v326_v12, %v325_v6  ;;  %v330_v31 = vor.u32 %v329_v19, %v328_v14  ;;  %v887_v6 = vpop.eup %886 }
  0x49   :  { %v264_v16 = vsel %vm262_vm6, %v263_v8, %v1027_v50  ;;  %v332_v27 = vshrl.u32 %v955_v9, %v323_v54  ;;  %v334_v32 = vshll.u32 %v955_v9, %v322_v41  ;;  %v335_v34 = vshrl.u32 %v956_v22, %v323_v54 }
  0x4a   :  { %v265_v26 = vadd.s32 %v264_v16, %v260_v5  ;;  %v337_v35 = vshll.u32 %v956_v22, %v322_v41  ;;  %vm340_vm7 = vcmp.lt.s32.totalorder %v321_v62, 1  ;;  %v338_v37 = vshrl.u32 %v957_v25, %v323_v54 }
  0x4b   :  { %v333_v36 = vor.u32 %v332_v27, %v331_v20  ;;  %vm341_vm8 = vcmp.lt.s32.totalorder %v321_v62, 2  ;;  %v421_v39 = vadd.s32 1, %v839_v21  ;;  %v336_v43 = vor.u32 %v335_v34, %v334_v32 }
  0x4c   :  { %v266_v33 = vadd.s32 536870912, %v265_v26  ;;  %vm342_vm9 = vcmp.lt.s32.totalorder %v321_v62, 3  ;;  %vm343_vm10 = vcmp.lt.s32.totalorder %v321_v62, 4  ;;  %v339_v44 = vor.u32 %v338_v37, %v337_v35 }
  0x4d   :  { %v344_v45 = vsel %vm340_vm7, %v324_v28, %v327_v30  ;;  %v345_v46 = vsel %vm343_vm10, %v333_v36, 2102212464  ;;  %v348_v47 = vsel %vm340_vm7, %v327_v30, %v330_v31  ;;  %v349_v51 = vsel %vm343_vm10, %v336_v43, 920167782 }
  0x4e   :  { %v1065_v40 = vshrl.u32 %v266_v33, 30  ;;  %v346_v41 = vsel %vm342_vm9, %v330_v31, %v345_v46  ;;  %v352_v52 = vsel %vm340_vm7, %v330_v31, %v333_v36  ;;  %v153_v54 = vmul.f32 0.6931472, %v883_v58 }
  0x4f   :  { %v155_v55 = vmul.f32 0.6931472, %v885_v0  ;;  %v350_v61 = vsel %vm342_vm9, %v333_v36, %v349_v51  ;;  %v353_v5 = vsel %vm343_vm10, %v339_v44, 1326507024  ;;  %vm422_vm11 = vcmp.gt.s32.totalorder %v421_v39, 0 }
  0x50   :  { %v268_v50 = vshll.u32 %v1065_v40, 30  ;;  %v351_v12 = vsel %vm341_vm8, %v348_v47, %v350_v61  ;;  %v354_v14 = vsel %vm342_vm9, %v336_v43, %v353_v5  ;;  %v347_v19 = vsel %vm341_vm8, %v344_v45, %v346_v41 }
  0x51   :  { %v355_v16 = vsel %vm341_vm8, %v352_v52, %v354_v14  ;;  %v1080_v20 = vmul.u32.u64.low %v1052_v3, %v351_v12  ;;  %v1081_v21 = vmul.u32.u64.high %v1052_v3, %v351_v12, %v1080_v20  ;;  %v1084_v58 = vmul.f32 -2.0, %v151_v24 }
  0x52   :  { %v1073_v8 = vsub.s32 %v265_v26, %v268_v50  ;;  %v1088_v26 = vmul.u32.u64.low %v1052_v3, %v355_v16  ;;  %v1089_v28 = vmul.u32.u64.high %v1052_v3, %v355_v16, %v1088_v26  ;;  %v157_v30 = vmul.f32 0.6931472, %v887_v6 }
  0x53   :  { %v1094_v62 = vmul.f32 6.2831855, %v1039_v2  ;;  %v423_v31 = vsel %vm422_vm11, %v421_v39, 0  ;;  %v363_v32 = vmul.u32 %v1052_v3, %v347_v19  ;;  %v1098_v24 = vshll.u32 %v419_v18, 8 }
  0x54   :  { %v271_v0 = vsub.s32 0, %v1073_v8  ;;  %v518_v33 = vshrl.u32 %v517_v29, 23  ;;  %v1100_v34 = vmul.f32 -2.0, %v153_v54  ;;  %v366_v35 = vadd.s32 1, %v1081_v21 }
  0x55   :  { %v425_v36 = vand.u32 31, %v423_v31  ;;  %v1105_v57 = vand.u32 8388607, %v514_v23  ;;  %v1107_v59 = vmul.f32 -2.0, %v155_v55  ;;  %890 = vrsqrt.f32 %v1084_v58 }
  0x56   :  { %v832_v27 = vmin.u32 %v271_v0, %v1073_v8  ;;  %vm365_vm12 = vc.u32 %v1089_v28, %v1080_v20  ;;  %v1112_v3 = vmul.f32 -2.0, %v157_v30  ;;  %v261_v18 = vadd.s32 %v1026_v49, %v1032_v53 }
  0x57   :  { %v367_v29 = vsel %vm365_vm12, %v366_v35, %v1081_v21  ;;  %v426_v39 = vsub.s32 32, %v425_v36  ;;  %v291_v44 = vsub.s32 4, %v1065_v40  ;;  %v1118_v46 = vshrl.u32 %v423_v31, 5 }
  0x58   :  { %v273_v37 = vclz %v832_v27  ;;  %v368_v45 = vadd.s32 %v367_v29, %v363_v32  ;;  %v428_v47 = vshll.u32 %v952_v63, %v425_v36  ;;  %v431_v41 = vshll.u32 %v953_v1, %v425_v36 }
  0x59   :  { %v429_v50 = vshrl.u32 %v953_v1, %v426_v39  ;;  %v437_v51 = vshll.u32 %v955_v9, %v425_v36  ;;  %v432_v49 = vshrl.u32 %v954_v7, %v426_v39  ;;  %v438_v53 = vshrl.u32 %v956_v22, %v426_v39 }
  0x5a   :  { %v833_v43 = vadd.s32 4294967294, %v273_v37  ;;  %v369_v52 = vadd.s32 536870912, %v368_v45  ;;  %v434_v55 = vshll.u32 %v954_v7, %v425_v36  ;;  %v435_v61 = vshrl.u32 %v955_v9, %v426_v39 }
  0x5b   :  { %v440_v5 = vshll.u32 %v956_v22, %v425_v36  ;;  %v430_v16 = vor.u32 %v429_v50, %v428_v47  ;;  %v439_v21 = vor.u32 %v438_v53, %v437_v51  ;;  %v441_v0 = vshrl.u32 %v957_v25, %v426_v39 }
  0x5c   :  { %vm834_vm13 = vcmp.lt.s32.totalorder %v833_v43, 0  ;;  %v1130_v19 = vshrl.u32 %v369_v52, 30  ;;  %v843_v26 = vadd.s32 4294967169, %v518_v33  ;;  %v433_v32 = vor.u32 %v432_v49, %v431_v41 }
  0x5d   :  { %v276_v54 = vsel %vm834_vm13, 0, %v833_v43  ;;  %v436_v35 = vor.u32 %v435_v61, %v434_v55  ;;  %v442_v36 = vor.u32 %v441_v0, %v440_v5  ;;  %vm443_vm15 = vcmp.lt.s32.totalorder %v1118_v46, 1 }
  0x5e   :  { %v277_v6 = vsub.s32 32, %v276_v54  ;;  %v278_v12 = vshll.u32 %v1073_v8, %v276_v54  ;;  %v281_v14 = vsub.s32 4294967266, %v276_v54  ;;  %v371_v27 = vshll.u32 %v1130_v19, 30  ;;  %v1137_v8 = vpop.eup %888 }
  0x5f   :  { %vm446_vm0 = vcmp.lt.s32.totalorder %v1118_v46, 4  ;;  %vm445_vm2 = vcmp.lt.s32.totalorder %v1118_v46, 3  ;;  %v427_v43 = vshrl.u32 %v952_v63, %v426_v39  ;;  %vm444_vm3 = vcmp.lt.s32.totalorder %v1118_v46, 2 }
  0x60   :  { %v279_v30 = vshrl.u32 %v261_v18, %v277_v6  ;;  %v282_v31 = vadd.s32 127, %v281_v14  ;;  %v1145_v29 = vsub.s32 %v368_v45, %v371_v27  ;;  %v448_v47 = vsel %vm446_vm0, %v436_v35, 2102212464 }
  0x61   :  { %v452_v50 = vsel %vm446_vm0, %v439_v21, 920167782  ;;  %v451_v45 = vsel %vm443_vm15, %v430_v16, %v433_v32  ;;  %v170_v49 = vand.u32 2147483648, %v1084_v58  ;;  %v455_v53 = vsel %vm443_vm15, %v433_v32, %v436_v35 }
  0x62   :  { %v280_v33 = vor.u32 %v279_v30, %v278_v12  ;;  %v283_v18 = vshll.u32 %v282_v31, 23  ;;  %v374_v51 = vsub.s32 0, %v1145_v29  ;;  %v891_v52 = vpop.eup %890  ;;  %v453_v39 = vsel %vm445_vm2, %v436_v35, %v452_v50 }
  0x63   :  { %v456_v54 = vsel %vm446_vm0, %v442_v36, 1326507024  ;;  %892 = vrsqrt.f32 %v1100_v34  ;;  %v524_v5 = vadd.s32 1, %v843_v26  ;;  %v447_v6 = vsel %vm443_vm15, %v427_v43, %v430_v16 }
  0x64   :  { %v284_v38 = vor.u32 4788187, %v283_v18  ;;  %v287_v41 = vcvt.s32.f32 %v280_v33  ;;  %v836_v61 = vmin.u32 %v374_v51, %v1145_v29  ;;  %v449_v12 = vsel %vm445_vm2, %v433_v32, %v448_v47 }
  0x65   :  { %v454_v14 = vsel %vm444_vm3, %v451_v45, %v453_v39  ;;  %v457_v0 = vsel %vm445_vm2, %v439_v21, %v456_v54  ;;  %v292_v31 = vsel %vm207_vm14, %v291_v44, %v1065_v40  ;;  %v450_v18 = vsel %vm444_vm3, %v447_v6, %v449_v12 }
  0x66   :  { %v285_v55 = vand.u32 2147483647, %v284_v38  ;;  %v376_v27 = vclz %v836_v61  ;;  %v458_v26 = vsel %vm444_vm3, %v455_v53, %v457_v0  ;;  %vm525_vm4 = vcmp.gt.s32.totalorder %v524_v5, 0 }
  0x67   :  { %v1180_v16 = vmul.u32.u64.low %v1098_v24, %v458_v26  ;;  %v1181_v35 = vmul.u32.u64.high %v1098_v24, %v458_v26, %v1180_v16  ;;  %v1184_v32 = vmul.u32.u64.low %v1098_v24, %v454_v14  ;;  %v1185_v36 = vmul.u32.u64.high %v1098_v24, %v454_v14, %v1184_v32 }
  0x68   :  { %v288_v30 = vmul.f32 %v287_v41, %v285_v55  ;;  %v837_v21 = vadd.s32 4294967294, %v376_v27  ;;  %v1191_v40 = vmul.f32 %v891_v52, %v1084_v58  ;;  %v177_v44 = vand.u32 2147483648, %v1100_v34 }
  0x69   :  { %v294_v43 = vsel %vm1141_vm1, 0, %v292_v31  ;;  %v526_v47 = vsel %vm525_vm4, %v524_v5, 0  ;;  %v364_v38 = vadd.s32 %v1080_v20, %v1089_v28  ;;  %v466_v45 = vmul.u32 %v1098_v24, %v450_v18 }
  0x6a   :  { %v289_v33 = vxor.u32 2147483648, %v288_v30  ;;  %vm838_vm5 = vcmp.lt.s32.totalorder %v837_v21, 0  ;;  %v528_v41 = vand.u32 31, %v526_v47  ;;  %vm468_vm6 = vc.u32 %v1181_v35, %v1184_v32 }
  0x6b   :  { %v379_v51 = vsel %vm838_vm5, 0, %v837_v21  ;;  %v1207_v54 = vand.u32 3, %v294_v43  ;;  %v469_v20 = vadd.s32 1, %v1185_v36  ;;  %v522_v61 = vor.u32 8388608, %v1105_v57 }
  0x6c   :  { %v290_v50 = vsel %vm207_vm14, %v289_v33, %v288_v30  ;;  %v380_v52 = vsub.s32 32, %v379_v51  ;;  %v381_v39 = vshll.u32 %v1145_v29, %v379_v51  ;;  %v384_v53 = vsub.s32 4294967266, %v379_v51 }
  0x6d   :  { %v293_v46 = vsel %vm1141_vm1, %v979_v13, %v290_v50  ;;  %v529_v28 = vsub.s32 32, %v528_v41  ;;  %v1211_v5 = vshrl.u32 %v526_v47, 5  ;;  %vm310_vm7 = vcmp.lt.s32.totalorder %v982_v15, 0 }
  0x6e   :  { %894 = vcosq.f32 %v293_v46  ;;  %v382_v55 = vshrl.u32 %v364_v38, %v380_v52  ;;  %v385_v37 = vadd.s32 127, %v384_v53  ;;  %v470_v24 = vsel %vm468_vm6, %v469_v20, %v1185_v36 }
  0x6f   :  { %896 = vsinq.f32 %v293_v46  ;;  %v534_v6 = vshll.u32 %v953_v1, %v528_v41  ;;  %v535_v29 = vshrl.u32 %v954_v7, %v529_v28  ;;  %v537_v12 = vshll.u32 %v954_v7, %v528_v41 }
  0x70   :  { %vm1220_vm8 = vcmp.le.f32.partialorder %v308_v56, 0.7853982  ;;  %v383_v0 = vor.u32 %v382_v55, %v381_v39  ;;  %v386_v57 = vshll.u32 %v385_v37, 23  ;;  %v471_v30 = vadd.s32 %v470_v24, %v466_v45  ;;  %v893_v27 = vpop.eup %892 }
  0x71   :  { %v538_v31 = vshrl.u32 %v955_v9, %v529_v28  ;;  %v531_v26 = vshll.u32 %v952_v63, %v528_v41  ;;  %v532_v16 = vshrl.u32 %v953_v1, %v529_v28  ;;  %v540_v36 = vshll.u32 %v955_v9, %v528_v41 }
  0x72   :  { %v541_v33 = vshrl.u32 %v956_v22, %v529_v28  ;;  %vm300_vm9 = vcmp.eq.s32.totalorder %v1207_v54, 0  ;;  %vm303_vm10 = vcmp.eq.s32.totalorder %v1207_v54, 2  ;;  %v387_v56 = vor.u32 4788187, %v386_v57 }
  0x73   :  { %v390_v21 = vcvt.s32.f32 %v383_v0  ;;  %v472_v18 = vadd.s32 536870912, %v471_v30  ;;  %vm299_vm11 = vcmp.lt.s32.totalorder %v1207_v54, 2  ;;  %v543_v47 = vshll.u32 %v956_v22, %v528_v41 }
  0x74   :  { %v542_v43 = vor.u32 %v541_v33, %v540_v36  ;;  %v544_v50 = vshrl.u32 %v957_v25, %v529_v28  ;;  %v1234_v38 = vshll.u32 %v522_v61, 8  ;;  %vm297_vm12 = vweird.f32 %v979_v13 }
  0x75   :  { %v388_v46 = vand.u32 2147483647, %v387_v56  ;;  %v1237_v51 = vshrl.u32 %v472_v18, 30  ;;  %v536_v45 = vor.u32 %v535_v29, %v534_v6  ;;  %v539_v52 = vor.u32 %v538_v31, %v537_v12 }
  0x76   :  { %vm167_vm13 = vcmp.eq.f32.partialorder %v1084_v58, inf  ;;  %v533_v39 = vor.u32 %v532_v16, %v531_v26  ;;  %v545_v53 = vor.u32 %v544_v50, %v543_v47  ;;  %vm546_vm14 = vcmp.lt.s32.totalorder %v1211_v5, 1 }
  0x77   :  { %vm549_vm15 = vcmp.lt.s32.totalorder %v1211_v5, 4  ;;  %vm174_vm0 = vcmp.eq.f32.partialorder %v1100_v34, inf  ;;  %v391_v41 = vmul.f32 %v390_v21, %v388_v46  ;;  %v474_v20 = vshll.u32 %v1237_v51, 30 }
  0x78   :  { %v530_v55 = vshrl.u32 %v952_v63, %v529_v28  ;;  %vm548_vm1 = vcmp.lt.s32.totalorder %v1211_v5, 3  ;;  %v394_v37 = vsub.s32 4, %v1130_v19  ;;  %vm547_vm2 = vcmp.lt.s32.totalorder %v1211_v5, 2 }
  0x79   :  { %v555_v61 = vsel %vm549_vm15, %v542_v43, 920167782  ;;  %v559_v24 = vsel %vm549_vm15, %v545_v53, 1326507024  ;;  %v392_v6 = vxor.u32 2147483648, %v391_v41  ;;  %v1248_v29 = vsub.s32 %v471_v30, %v474_v20 }
  0x7a   :  { %v551_v12 = vsel %vm549_vm15, %v539_v52, 2102212464  ;;  %v558_v0 = vsel %vm546_vm14, %v536_v45, %v539_v52  ;;  %v554_v31 = vsel %vm546_vm14, %v533_v39, %v536_v45  ;;  %v556_v28 = vsel %vm548_vm1, %v539_v52, %v555_v61 }
  0x7b   :  { %v895_v57 = vpop.eup %894  ;;  %v560_v26 = vsel %vm548_vm1, %v542_v43, %v559_v24  ;;  %v620_v16 = vand.u32 2139095040, %v1094_v62  ;;  %vm169_vm3 = vcmp.eq.f32.partialorder %v1084_v58, 0.0  ;;  %v393_v33 = vsel %vm310_vm7, %v392_v6, %v391_v41 }
  0x7c   :  { %v897_v36 = vpop.eup %896  ;;  %v304_v30 = vxor.u32 2147483648, %v895_v57  ;;  %v477_v56 = vsub.s32 0, %v1248_v29  ;;  %v550_v21 = vsel %vm546_vm14, %v530_v55, %v533_v39  ;;  %v396_v47 = vsel %vm1220_vm8, %v982_v15, %v393_v33 }
  0x7d   :  { %v301_v18 = vxor.u32 2147483648, %v897_v36  ;;  %v552_v43 = vsel %vm548_vm1, %v536_v45, %v551_v12  ;;  %v561_v50 = vsel %vm547_vm2, %v558_v0, %v560_v26  ;;  %vm176_vm4 = vcmp.eq.f32.partialorder %v1100_v34, 0.0 }
  0x7e   :  { %v305_v46 = vsel %vm303_vm10, %v304_v30, %v897_v36  ;;  %898 = vcosq.f32 %v396_v47  ;;  %v840_v52 = vmin.u32 %v477_v56, %v1248_v29  ;;  %v557_v39 = vsel %vm547_vm2, %v554_v31, %v556_v28 }
  0x7f   :  { %v173_v53 = vmul.f32 %v893_v27, %v1100_v34  ;;  %v302_v41 = vsel %vm300_vm9, %v895_v57, %v301_v18  ;;  %v395_v45 = vsel %vm310_vm7, %v394_v37, %v1130_v19  ;;  %900 = vsinq.f32 %v396_v47 }
  0x80   :  { %v306_v20 = vsel %vm299_vm11, %v302_v41, %v305_v46  ;;  %v479_v55 = vclz %v840_v52  ;;  %v1287_v61 = vmul.u32.u64.low %v1234_v38, %v561_v50  ;;  %v1288_v24 = vmul.u32.u64.high %v1234_v38, %v561_v50, %v1287_v61 }
  0x81   :  { %v307_v6 = vsel %vm297_vm12, nan, %v306_v20  ;;  %v553_v27 = vsel %vm547_vm2, %v550_v21, %v552_v43  ;;  %v1295_v12 = vmul.u32.u64.low %v1234_v38, %v557_v39  ;;  %v1296_v0 = vmul.u32.u64.high %v1234_v38, %v557_v39, %v1295_v12 }
  0x82   :  { %v168_v19 = vsel %vm167_vm13, %v1084_v58, %v1191_v40  ;;  %v397_v54 = vsel %vm1220_vm8, 0, %v395_v45  ;;  %vm413_vm5 = vcmp.lt.s32.totalorder %v997_v60, 0  ;;  %v841_v13 = vadd.s32 4294967294, %v479_v55 }
  0x83   :  { %v621_v37 = vshrl.u32 %v620_v16, 23  ;;  %v175_v5 = vsel %vm174_vm0, %v1100_v34, %v173_v53  ;;  %v467_v57 = vadd.s32 %v1184_v32, %v1181_v35  ;;  %v617_v31 = vand.u32 2147483647, %v1094_v62 }
  0x84   :  { %v720_v28 = vmul.f32 %v307_v6, %v307_v6  ;;  %vm842_vm6 = vcmp.lt.s32.totalorder %v841_v13, 0  ;;  %v569_v40 = vmul.u32 %v1234_v38, %v553_v27  ;;  %vm571_vm7 = vc.u32 %v1288_v24, %v1295_v12 }
  0x85   :  { %v847_v14 = vadd.s32 4294967169, %v621_v37  ;;  %v1315_v26 = vand.u32 3, %v397_v54  ;;  %vm1319_vm8 = vcmp.le.f32.partialorder %v411_v17, 0.7853982  ;;  %v482_v36 = vsel %vm842_vm6, 0, %v841_v13 }
  0x86   :  { %v572_v35 = vadd.s32 1, %v1296_v0  ;;  %v725_v32 = vsub.f32 1.0, %v720_v28  ;;  %v483_v30 = vsub.s32 32, %v482_v36  ;;  %v484_v33 = vshll.u32 %v1248_v29, %v482_v36 }
  0x87   :  { %v487_v38 = vsub.s32 4294967266, %v482_v36  ;;  %v627_v56 = vadd.s32 1, %v847_v14  ;;  %v1329_v21 = vsel %vm169_vm3, %v170_v49, %v168_v19  ;;  %v497_v17 = vsub.s32 4, %v1237_v51 }
  0x88   :  { %v573_v18 = vsel %vm571_vm7, %v572_v35, %v1296_v0  ;;  %v624_v47 = vand.u32 8388607, %v617_v31  ;;  %v485_v43 = vshrl.u32 %v467_v57, %v483_v30  ;;  %v1339_v29 = vsel %vm176_vm4, %v177_v44, %v175_v5 }
  0x89   :  { %v488_v50 = vadd.s32 127, %v487_v38  ;;  %v574_v46 = vadd.s32 %v573_v18, %v569_v40  ;;  %vm628_vm9 = vcmp.gt.s32.totalorder %v627_v56, 0  ;;  %902 = vrsqrt.f32 %v1107_v59 }
  0x8a   :  { %vm406_vm10 = vcmp.eq.s32.totalorder %v1315_v26, 2  ;;  %v629_v58 = vsel %vm628_vm9, %v627_v56, 0  ;;  %v486_v49 = vor.u32 %v485_v43, %v484_v33  ;;  %v1343_v53 = vmax.f32 %v725_v32, 0.0 }
  0x8b   :  { %v489_v52 = vshll.u32 %v488_v50, 23  ;;  %v575_v39 = vadd.s32 536870912, %v574_v46  ;;  %v899_v41 = vpop.eup %898  ;;  %v1348_v45 = vsel %vm413_vm5, %v497_v17, %v1237_v51  ;;  %v625_v20 = vor.u32 8388608, %v624_v47 }
  0x8c   :  { %v631_v34 = vand.u32 31, %v629_v58  ;;  %v785_v44 = vmul.f32 %v307_v6, %v1329_v21  ;;  %v901_v55 = vpop.eup %900  ;;  %v407_v61 = vxor.u32 2147483648, %v899_v41  ;;  %v493_v0 = vcvt.s32.f32 %v486_v49 }
  0x8d   :  { %v490_v27 = vor.u32 4788187, %v489_v52  ;;  %v1351_v19 = vshrl.u32 %v575_v39, 30  ;;  %vm402_vm11 = vcmp.lt.s32.totalorder %v1315_v26, 2  ;;  %vm403_vm12 = vcmp.eq.s32.totalorder %v1315_v26, 0 }
  0x8e   :  { %v404_v54 = vxor.u32 2147483648, %v901_v55  ;;  %v632_v13 = vsub.s32 32, %v631_v34  ;;  %790 = vst [vmem:[#allocation4] sm:$0xff] %v785_v44  ;;  %v500_v51 = vsel %vm1319_vm8, 0, %v1348_v45  ;;  %904 = vrsqrt.f32 %v1343_v53 }
  0x8f   :  { %v491_v37 = vand.u32 2147483647, %v490_v27  ;;  %v577_v6 = vshll.u32 %v1351_v19, 30  ;;  %vm400_vm13 = vweird.f32 %v982_v15  ;;  %v408_v5 = vsel %vm406_vm10, %v407_v61, %v901_v55 }
  0x90   :  { %v1365_v57 = vadd.s32 %v1295_v12, %v1288_v24  ;;  %v634_v28 = vshll.u32 %v952_v63, %v631_v34  ;;  %v1368_v40 = vshll.u32 %v625_v20, 8  ;;  %v405_v14 = vsel %vm403_vm12, %v899_v41, %v404_v54 }
  0x91   :  { %v494_v36 = vmul.f32 %v493_v0, %v491_v37  ;;  %v1370_v35 = vsub.s32 %v574_v46, %v577_v6  ;;  %v635_v32 = vshrl.u32 %v953_v1, %v632_v13  ;;  %v630_v30 = vshrl.u32 %v629_v58, 5 }
  0x92   :  { %v637_v33 = vshll.u32 %v953_v1, %v631_v34  ;;  %v638_v38 = vshrl.u32 %v954_v7, %v632_v13  ;;  %v740_v56 = vand.u32 2147483648, %v1343_v53  ;;  %v633_v12 = vshrl.u32 %v952_v63, %v632_v13 }
  0x93   :  { %v495_v17 = vxor.u32 2147483648, %v494_v36  ;;  %v580_v24 = vsub.s32 0, %v1370_v35  ;;  %v640_v18 = vshll.u32 %v954_v7, %v631_v34  ;;  %v409_v47 = vsel %vm402_vm11, %v405_v14, %v408_v5 }
  0x94   :  { %v641_v43 = vshrl.u32 %v955_v9, %v632_v13  ;;  %v643_v50 = vshll.u32 %v955_v9, %v631_v34  ;;  %v644_v1 = vshrl.u32 %v956_v22, %v632_v13  ;;  %v636_v49 = vor.u32 %v635_v32, %v634_v28 }
  0x95   :  { %v496_v46 = vsel %vm413_vm5, %v495_v17, %v494_v36  ;;  %v844_v58 = vmin.u32 %v580_v24, %v1370_v35  ;;  %v646_v52 = vshll.u32 %v956_v22, %v631_v34  ;;  %v639_v7 = vor.u32 %v638_v38, %v637_v33 }
  0x96   :  { %v499_v63 = vsel %vm1319_vm8, %v997_v60, %v496_v46  ;;  %v642_v26 = vor.u32 %v641_v43, %v640_v18  ;;  %v645_v39 = vor.u32 %v644_v1, %v643_v50  ;;  %vm737_vm14 = vcmp.eq.f32.partialorder %v1343_v53, inf  ;;  %v903_v9 = vpop.eup %902 }
  0x97   :  { %906 = vcosq.f32 %v499_v63  ;;  %v582_v41 = vclz %v844_v58  ;;  %v647_v20 = vshrl.u32 %v957_v25, %v632_v13  ;;  %vm649_vm15 = vcmp.lt.s32.totalorder %v630_v30, 1 }
  0x98   :  { %vm739_vm0 = vcmp.eq.f32.partialorder %v1343_v53, 0.0  ;;  %908 = vsinq.f32 %v499_v63  ;;  %vm650_vm1 = vcmp.lt.s32.totalorder %v630_v30, 2  ;;  %vm651_vm2 = vcmp.lt.s32.totalorder %v630_v30, 3 }
  0x99   :  { %vm652_vm3 = vcmp.lt.s32.totalorder %v630_v30, 4  ;;  %v845_v22 = vadd.s32 4294967294, %v582_v41  ;;  %v648_v34 = vor.u32 %v647_v20, %v646_v52  ;;  %v653_v44 = vsel %vm649_vm15, %v633_v12, %v636_v49 }
  0x9a   :  { %v654_v55 = vsel %vm652_vm3, %v642_v26, 2102212464  ;;  %v657_v27 = vsel %vm649_vm15, %v636_v49, %v639_v7  ;;  %v658_v0 = vsel %vm652_vm3, %v645_v39, 920167782  ;;  %v661_v54 = vsel %vm649_vm15, %v639_v7, %v642_v26 }
  0x9b   :  { %v655_v61 = vsel %vm651_vm2, %v639_v7, %v654_v55  ;;  %vm181_vm4 = vcmp.eq.f32.partialorder %v1107_v59, inf  ;;  %v410_v25 = vsel %vm400_vm13, nan, %v409_v47  ;;  %vm846_vm5 = vcmp.lt.s32.totalorder %v845_v22, 0  ;;  %v905_v6 = vpop.eup %904 }
  0x9c   :  { %v659_v13 = vsel %vm651_vm2, %v642_v26, %v658_v0  ;;  %v662_v37 = vsel %vm652_vm3, %v648_v34, 1326507024  ;;  %v585_v5 = vsel %vm846_vm5, 0, %v845_v22  ;;  %v656_v28 = vsel %vm650_vm1, %v653_v44, %v655_v61 }
  0x9d   :  { %v660_v14 = vsel %vm650_vm1, %v657_v27, %v659_v13  ;;  %v663_v36 = vsel %vm651_vm2, %v645_v39, %v662_v37  ;;  %v586_v32 = vsub.s32 32, %v585_v5  ;;  %v587_v33 = vshll.u32 %v1370_v35, %v585_v5 }
  0x9e   :  { %v590_v38 = vsub.s32 4294967266, %v585_v5  ;;  %v664_v17 = vsel %vm650_vm1, %v661_v54, %v663_v36  ;;  %vm183_vm6 = vcmp.eq.f32.partialorder %v1107_v59, 0.0  ;;  %vm503_vm7 = vweird.f32 %v997_v60 }
  0x9f   :  { %v1406_v15 = vmul.u32.u64.low %v1368_v40, %v664_v17  ;;  %v1407_v24 = vmul.u32.u64.high %v1368_v40, %v664_v17, %v1406_v15  ;;  %v1410_v12 = vmul.u32.u64.low %v1368_v40, %v660_v14  ;;  %v1411_v18 = vmul.u32.u64.high %v1368_v40, %v660_v14, %v1410_v12 }
  0xa0   :  { %v588_v47 = vshrl.u32 %v1365_v57, %v586_v32  ;;  %v591_v43 = vadd.s32 127, %v590_v38  ;;  %v721_v35 = vmul.f32 %v410_v25, %v410_v25  ;;  %v736_v30 = vmul.f32 %v905_v6, %v1343_v53 }
  0xa1   :  { %v184_v50 = vand.u32 2147483648, %v1107_v59  ;;  %v504_v1 = vand.u32 3, %v500_v51  ;;  %v672_v46 = vmul.u32 %v1368_v40, %v656_v28  ;;  %v786_v58 = vmul.f32 %v410_v25, %v1339_v29 }
  0xa2   :  { %v589_v49 = vor.u32 %v588_v47, %v587_v33  ;;  %v592_v52 = vshll.u32 %v591_v43, 23  ;;  %v726_v63 = vsub.f32 1.0, %v721_v35  ;;  %v738_v57 = vsel %vm737_vm14, %v1343_v53, %v736_v30 }
  0xa3   :  { %v180_v7 = vmul.f32 %v903_v9, %v1107_v59  ;;  %vm674_vm9 = vc.u32 %v1407_v24, %v1410_v12  ;;  %v675_v16 = vadd.s32 1, %v1411_v18  ;;  %v741_v45 = vsel %vm739_vm0, %v740_v56, %v738_v57  ;;  %791 = vst [vmem:[#allocation4 + $0x10] sm:$0xff] %v786_v58 }
  0xa4   :  { %v593_v51 = vor.u32 4788187, %v592_v52  ;;  %v596_v40 = vcvt.s32.f32 %v589_v49  ;;  %v731_v26 = vmax.f32 %v726_v63, 0.0  ;;  %v775_v39 = vsub.f32 0.0, %v741_v45  ;;  %v907_v41 = vpop.eup %906 }
  0xa5   :  { %vm506_vm8 = vcmp.eq.s32.totalorder %v504_v1, 0  ;;  %vm509_vm10 = vcmp.eq.s32.totalorder %v504_v1, 2  ;;  %v676_v9 = vsel %vm674_vm9, %v675_v16, %v1411_v18  ;;  %vm770_vm11 = vcmp.lt.f32.partialorder %v974_v10, 0.5  ;;  %v909_v20 = vpop.eup %908 }
  0xa6   :  { %v510_v22 = vxor.u32 2147483648, %v907_v41  ;;  %v594_v34 = vand.u32 2147483647, %v593_v51  ;;  %v677_v44 = vadd.s32 %v676_v9, %v672_v46  ;;  %910 = vrsqrt.f32 %v731_v26 }
  0xa7   :  { %v182_v53 = vsel %vm181_vm4, %v1107_v59, %v180_v7  ;;  %912 = vrsqrt.f32 %v1112_v3  ;;  %vm505_vm12 = vcmp.lt.s32.totalorder %v504_v1, 2  ;;  %v507_v56 = vxor.u32 2147483648, %v909_v20 }
  0xa8   :  { %v511_v55 = vsel %vm509_vm10, %v510_v22, %v909_v20  ;;  %v597_v61 = vmul.f32 %v596_v40, %v594_v34  ;;  %v678_v27 = vadd.s32 536870912, %v677_v44  ;;  %v780_v0 = vsel %vm770_vm11, %v741_v45, %v775_v39 }
  0xa9   :  { %v508_v54 = vsel %vm506_vm8, %v907_v41, %v507_v56  ;;  %vm1444_vm13 = vcmp.le.f32.partialorder %v514_v23, 0.7853982  ;;  %vm516_vm14 = vcmp.lt.s32.totalorder %v1042_v4, 0  ;;  %v795_v25 = vmul.f32 %v780_v0, %v1329_v21 }
  0xaa   :  { %v1452_v13 = vsel %vm183_vm6, %v184_v50, %v182_v53  ;;  %v512_v37 = vsel %vm505_vm12, %v508_v54, %v511_v55  ;;  %v598_v6 = vxor.u32 2147483648, %v597_v61  ;;  %v1454_v5 = vshrl.u32 %v678_v27, 30 }
  0xab   :  { %v513_v28 = vsel %vm503_vm7, nan, %v512_v37  ;;  %800 = vst [vmem:[#allocation4 + $0x8] sm:$0xff] %v795_v25  ;;  %v600_v21 = vsub.s32 4, %v1351_v19  ;;  %vm744_vm15 = vcmp.eq.f32.partialorder %v731_v26, inf  ;;  %v747_v43 = vand.u32 2147483648, %v731_v26 }
  0xac   :  { %v599_v23 = vsel %vm516_vm14, %v598_v6, %v597_v61  ;;  %v680_v14 = vshll.u32 %v1454_v5, 30  ;;  %v722_v36 = vmul.f32 %v513_v28, %v513_v28  ;;  %v787_v32 = vmul.f32 %v513_v28, %v1452_v13 }
  0xad   :  { %v602_v59 = vsel %vm1444_vm13, %v1042_v4, %v599_v23  ;;  %v601_v15 = vsel %vm516_vm14, %v600_v21, %v1351_v19  ;;  %vm746_vm0 = vcmp.eq.f32.partialorder %v731_v26, 0.0  ;;  %vm771_vm1 = vcmp.lt.f32.partialorder %v976_v11, 0.5 }
  0xae   :  { %914 = vcosq.f32 %v602_v59  ;;  %v681_v33 = vsub.s32 %v677_v44, %v680_v14  ;;  %v727_v38 = vsub.f32 1.0, %v722_v36  ;;  %792 = vst [vmem:[#allocation4 + $0x20] sm:$0xff] %v787_v32  ;;  %v603_v30 = vsel %vm1444_vm13, 0, %v601_v15 }
  0xaf   :  { %916 = vsinq.f32 %v602_v59  ;;  %v607_v52 = vand.u32 3, %v603_v30  ;;  %vm188_vm2 = vcmp.eq.f32.partialorder %v1112_v3, inf  ;;  %v673_v19 = vadd.s32 %v1410_v12, %v1407_v24 }
  0xb0   :  { %v683_v60 = vsub.s32 0, %v681_v33  ;;  %v1466_v17 = vmax.f32 %v727_v38, 0.0  ;;  %v159_v7 = vmul.f32 0.6931472, %v1137_v8  ;;  %vm190_vm4 = vcmp.eq.f32.partialorder %v1112_v3, 0.0 }
  0xb1   :  { %v191_v11 = vand.u32 2147483648, %v1112_v3  ;;  %vm612_vm5 = vcmp.eq.s32.totalorder %v607_v52, 2  ;;  %vm609_vm6 = vcmp.eq.s32.totalorder %v607_v52, 0  ;;  %vm608_vm7 = vcmp.lt.s32.totalorder %v607_v52, 2 }
  0xb2   :  { %v848_v18 = vmin.u32 %v683_v60, %v681_v33  ;;  %918 = vrsqrt.f32 %v1466_v17  ;;  %vm606_vm9 = vweird.f32 %v1042_v4  ;;  %v1485_v56 = vmul.f32 -2.0, %v159_v7 }
  0xb3   :  { %v911_v47 = vpop.eup %910  ;;  %vm751_vm8 = vcmp.eq.f32.partialorder %v1466_v17, inf  ;;  %v754_v10 = vand.u32 2147483648, %v1466_v17  ;;  %vm753_vm10 = vcmp.eq.f32.partialorder %v1466_v17, 0.0  ;;  %vm772_vm11 = vcmp.lt.f32.partialorder %v987_v48, 0.5 }
  0xb4   :  { %v913_v35 = vpop.eup %912  ;;  %v685_v50 = vclz %v848_v18  ;;  %v743_v1 = vmul.f32 %v911_v47, %v731_v26  ;;  %920 = vrsqrt.f32 %v1485_v56  ;;  %vm619_vm12 = vcmp.lt.s32.totalorder %v1094_v62, 0 }
  0xb5   :  { %v187_v49 = vmul.f32 %v913_v35, %v1112_v3  ;;  %vm618_vm13 = vcmp.le.f32.partialorder %v617_v31, 0.7853982  ;;  %v703_v60 = vsub.s32 4, %v1454_v5  ;;  %vm195_vm14 = vcmp.eq.f32.partialorder %v1485_v56, inf }
  0xb6   :  { %v849_v46 = vadd.s32 4294967294, %v685_v50  ;;  %v745_v58 = vsel %vm744_vm15, %v731_v26, %v743_v1 }
  0xb7   :  { %v748_v63 = vsel %vm746_vm0, %v747_v43, %v745_v58  ;;  %v189_v41 = vsel %vm188_vm2, %v1112_v3, %v187_v49  ;;  %v704_v48 = vsel %vm619_vm12, %v703_v60, %v1454_v5 }
  0xb8   :  { %vm850_vm3 = vcmp.lt.s32.totalorder %v849_v46, 0  ;;  %v776_v57 = vsub.f32 0.0, %v748_v63  ;;  %v1489_v55 = vsel %vm190_vm4, %v191_v11, %v189_v41  ;;  %v706_v47 = vsel %vm618_vm13, 0, %v704_v48 }
  0xb9   :  { %v688_v16 = vsel %vm850_vm3, 0, %v849_v46  ;;  %v710_v43 = vand.u32 3, %v706_v47 }
  0xba   :  { %v689_v45 = vsub.s32 32, %v688_v16  ;;  %v690_v51 = vshll.u32 %v681_v33, %v688_v16  ;;  %v693_v40 = vsub.s32 4294967266, %v688_v16  ;;  %v781_v26 = vsel %vm771_vm1, %v748_v63, %v776_v57 }
  0xbb   :  { %v915_v39 = vpop.eup %914  ;;  %v796_v9 = vmul.f32 %v781_v26, %v1339_v29  ;;  %vm197_vm1 = vcmp.eq.f32.partialorder %v1485_v56, 0.0  ;;  %vm715_vm2 = vcmp.eq.s32.totalorder %v710_v43, 2  ;;  %vm712_vm3 = vcmp.eq.s32.totalorder %v710_v43, 0 }
  0xbc   :  { %v917_v24 = vpop.eup %916  ;;  %v613_v12 = vxor.u32 2147483648, %v915_v39  ;;  %v691_v20 = vshrl.u32 %v673_v19, %v689_v45  ;;  %v694_v8 = vadd.s32 127, %v693_v40  ;;  %vm711_vm4 = vcmp.lt.s32.totalorder %v710_v43, 2 }
  0xbd   :  { %v610_v22 = vxor.u32 2147483648, %v917_v24  ;;  %801 = vst [vmem:[#allocation4 + $0x18] sm:$0xff] %v796_v9 }
  0xbe   :  { %v614_v34 = vsel %vm612_vm5, %v613_v12, %v917_v24  ;;  %v692_v44 = vor.u32 %v691_v20, %v690_v51  ;;  %v695_v53 = vshll.u32 %v694_v8, 23  ;;  %vm773_vm5 = vcmp.lt.f32.partialorder %v1019_v42, 0.5 }
  0xbf   :  { %v611_v29 = vsel %vm609_vm6, %v915_v39, %v610_v22  ;;  %v919_v61 = vpop.eup %918  ;;  %vm709_vm6 = vweird.f32 %v1094_v62 }
  0xc0   :  { %v615_v27 = vsel %vm608_vm7, %v611_v29, %v614_v34  ;;  %v696_v0 = vor.u32 4788187, %v695_v53  ;;  %v699_v54 = vcvt.s32.f32 %v692_v44  ;;  %v750_v4 = vmul.f32 %v919_v61, %v1466_v17 }
  0xc1   :  { %v616_v25 = vsel %vm606_vm9, nan, %v615_v27  ;;  %v921_v18 = vpop.eup %920 }
  0xc2   :  { %v697_v37 = vand.u32 2147483647, %v696_v0  ;;  %v723_v6 = vmul.f32 %v616_v25, %v616_v25  ;;  %v788_v3 = vmul.f32 %v616_v25, %v1489_v55  ;;  %v752_v28 = vsel %vm751_vm8, %v1466_v17, %v750_v4 }
  0xc3   :  { %v755_v36 = vsel %vm753_vm10, %v754_v10, %v752_v28  ;;  %v194_v31 = vmul.f32 %v921_v18, %v1485_v56  ;;  %vm774_vm8 = vcmp.lt.f32.partialorder %v1039_v2, 0.5 }
  0xc4   :  { %v700_v23 = vmul.f32 %v699_v54, %v697_v37  ;;  %v728_v14 = vsub.f32 1.0, %v723_v6  ;;  %793 = vst [vmem:[#allocation4 + $0x30] sm:$0xff] %v788_v3  ;;  %v777_v21 = vsub.f32 0.0, %v755_v36 }
  0xc5   :  { %v196_v5 = vsel %vm195_vm14, %v1485_v56, %v194_v31 }
  0xc6   :  { %v701_v59 = vxor.u32 2147483648, %v700_v23  ;;  %v733_v32 = vmax.f32 %v728_v14, 0.0  ;;  %v782_v33 = vsel %vm772_vm11, %v755_v36, %v777_v21 }
  0xc7   :  { %v797_v15 = vmul.f32 %v782_v33, %v1452_v13  ;;  %v198_v13 = vand.u32 2147483648, %v1485_v56 }
  0xc8   :  { %v702_v38 = vsel %vm619_vm12, %v701_v59, %v700_v23  ;;  %922 = vrsqrt.f32 %v733_v32  ;;  %vm758_vm15 = vcmp.eq.f32.partialorder %v733_v32, inf  ;;  %v761_v30 = vand.u32 2147483648, %v733_v32 }
  0xc9   :  { %v705_v17 = vsel %vm618_vm13, %v1094_v62, %v702_v38  ;;  %802 = vst [vmem:[#allocation4 + $0x28] sm:$0xff] %v797_v15  ;;  %vm760_vm0 = vcmp.eq.f32.partialorder %v733_v32, 0.0  ;;  %v199_v7 = vsel %vm197_vm1, %v198_v13, %v196_v5 }
  0xca   :  { %924 = vcosq.f32 %v705_v17 }
  0xcb   :  { %926 = vsinq.f32 %v705_v17 }
  0xd5   :  { %v923_v35 = vpop.eup %922 }
  0xd6   :  { %v757_v50 = vmul.f32 %v923_v35, %v733_v32 }
  0xd7   :  { %v925_v1 = vpop.eup %924 }
  0xd8   :  { %v927_v46 = vpop.eup %926  ;;  %v716_v58 = vxor.u32 2147483648, %v925_v1  ;;  %v759_v49 = vsel %vm758_vm15, %v733_v32, %v757_v50 }
  0xd9   :  { %v713_v52 = vxor.u32 2147483648, %v927_v46  ;;  %v762_v63 = vsel %vm760_vm0, %v761_v30, %v759_v49 }
  0xda   :  { %v717_v19 = vsel %vm715_vm2, %v716_v58, %v927_v46  ;;  %v778_v57 = vsub.f32 0.0, %v762_v63 }
  0xdb   :  { %v714_v16 = vsel %vm712_vm3, %v925_v1, %v713_v52 }
  0xdc   :  { %v718_v45 = vsel %vm711_vm4, %v714_v16, %v717_v19  ;;  %v783_v51 = vsel %vm773_vm5, %v762_v63, %v778_v57 }
  0xdd   :  { %v719_v40 = vsel %vm709_vm6, nan, %v718_v45  ;;  %v798_v26 = vmul.f32 %v783_v51, %v1489_v55 }
  0xde   :  { %v724_v39 = vmul.f32 %v719_v40, %v719_v40  ;;  %v789_v41 = vmul.f32 %v719_v40, %v199_v7 }
  0xdf   :  { %803 = vst [vmem:[#allocation4 + $0x38] sm:$0xff] %v798_v26 }
  0xe0   :  { %v729_v11 = vsub.f32 1.0, %v724_v39  ;;  %794 = vst [vmem:[#allocation4 + $0x40] sm:$0xff] %v789_v41 }
  0xe2   :  { %v734_v9 = vmax.f32 %v729_v11, 0.0 }
  0xe4   :  { %928 = vrsqrt.f32 %v734_v9  ;;  %vm765_vm7 = vcmp.eq.f32.partialorder %v734_v9, inf  ;;  %v768_v42 = vand.u32 2147483648, %v734_v9  ;;  %vm767_vm9 = vcmp.eq.f32.partialorder %v734_v9, 0.0 }
  0xf1   :  { %v929_v24 = vpop.eup %928 }
  0xf2   :  { %v764_v62 = vmul.f32 %v929_v24, %v734_v9 }
  0xf4   :  { %v766_v12 = vsel %vm765_vm7, %v734_v9, %v764_v62 }
  0xf5   :  { %v769_v20 = vsel %vm767_vm9, %v768_v42, %v766_v12 }
  0xf6   :  { %v779_v8 = vsub.f32 0.0, %v769_v20 }
  0xf8   :  { %v784_v22 = vsel %vm774_vm8, %v769_v20, %v779_v8 }
  0xf9   :  { %v799_v34 = vmul.f32 %v784_v22, %v199_v7 }
  0xfb   :  { %804 = vst [vmem:[#allocation4 + $0x48] sm:$0xff] %v799_v34 }
  0xfc   :  { %941 = shalt.err (!%p938_p4)
}
  0xfd   :  { %s959_s20 = smov 256   ;;  %s960_s21 = smov 16  }
  0xfe   :  { %816 = dma.vmem_to_hbm [thread:$0]  %s811_s18, 1280, %s1519_s1, [#allocation5], %s959_s20, %s959_s20, %s960_s21  }
  0xff   :  { %950 = dma.done.wait [#allocation5], 1280  }
 0x100   :  { %951 = vsyncadd [#allocation5], 4294966016 }
 0x101   :  { %820 = vsyncpa [#allocation5], 1 }

</bundles_post_ra>
